<compile_context>
chip_gen: v6e
topology: v6e:2x2x1
jax: 0.10.0
libtpu: 0.0.40
codegen_flags: <defaults>
</compile_context>

<pallas_src>
import jax
import jax.numpy as jnp
from jax.experimental import pallas as pl
from jax.experimental.pallas import tpu as pltpu


def mlp_kernel(x_ref, w1_ref, b1_ref, w2_ref, b2_ref, w3_ref, b3_ref, o_ref):
    # x_ref: (tm, input_dim) fp32; weights bf16; biases fp32; output fp32.
    x = x_ref[...].astype(jnp.bfloat16)          # in-kernel cast (cheap VPU work)
    # fc1 (fp32 accumulation on the MXU)
    h = jnp.dot(x, w1_ref[...], preferred_element_type=jnp.float32) + b1_ref[...]
    # relu -> fc2
    h = jnp.maximum(h, 0.0).astype(jnp.bfloat16)
    h = jnp.dot(h, w2_ref[...], preferred_element_type=jnp.float32) + b2_ref[...]
    # relu -> fc3
    h = jnp.maximum(h, 0.0).astype(jnp.bfloat16)
    o_ref[...] = (jnp.dot(h, w3_ref[...], preferred_element_type=jnp.float32)
                  + b3_ref[...]).astype(o_ref.dtype)


def _round_up(a, m):
    return (a + m - 1) // m * m


def preprocess_params(params):
    """One-time parameter prep (hoisted out of the per-call path):
    weights -> bf16 (MXU-native), biases -> fp32 (1, out) row vectors."""
    w1, b1, w2, b2, w3, b3 = params
    to_bf16 = lambda w: w.astype(jnp.bfloat16)
    to_row = lambda b: b.astype(jnp.float32).reshape(1, -1)
    return (to_bf16(w1), to_row(b1), to_bf16(w2), to_row(b2), to_bf16(w3), to_row(b3))


def mlp_forward(x, prepped, *, tile_m=1024):
    """Matches PyTorch: x.view(-1, input_dim) -> fc1 -> relu -> fc2 -> relu -> fc3.

    Weights are stored (in, out) so x @ W + b == x @ W_pt.T + b.
    `prepped` comes from preprocess_params() (bf16 weights, fp32 biases).
    """
    w1, b1, w2, b2, w3, b3 = prepped
    input_dim, hidden = w1.shape
    num_classes = w3.shape[1]

    x2d = x.reshape(-1, input_dim).astype(jnp.float32)   # == x.view(-1, input_dim)
    batch = x2d.shape[0]

    # Batch tile: as big as tile_m (VMEM is plentiful), multiple of 8 sublanes.
    tm = min(tile_m, _round_up(batch, 8))
    # v7x: ensure the "parallel" batch axis has >= 2 grid steps so both
    # TensorCores get work (unavoidable single step only for batch <= 8).
    if batch > 8 and pl.cdiv(batch, tm) < 2:
        tm = _round_up(pl.cdiv(batch, 2), 8)
    grid = (pl.cdiv(batch, tm),)

    const2d = lambda i: (0, 0)   # weights/biases stay VMEM-resident across grid

    # Scoped-VMEM estimate (lane/sublane padded, double-buffered). Only raise
    # the limit when we'd overflow v5e's 16 MiB default.
    def tile_bytes(r, c, itemsize):
        return _round_up(r, 8) * _round_up(c, 128) * itemsize

    est = 2 * (tile_bytes(tm, input_dim, 4) + tile_bytes(tm, num_classes, 4))
    est += 2 * (tile_bytes(input_dim, hidden, 2) + tile_bytes(hidden, hidden, 2)
                + tile_bytes(hidden, num_classes, 2))
    est += 2 * 3 * tile_bytes(1, max(hidden, num_classes), 4)
    cp_kwargs = dict(dimension_semantics=("parallel",))
    if est > (16 << 20):
        cp_kwargs["vmem_limit_bytes"] = min(est + (4 << 20), 96 << 20)

    out = pl.pallas_call(
        mlp_kernel,
        out_shape=jax.ShapeDtypeStruct((batch, num_classes), jnp.float32),
        grid=grid,
        in_specs=[
            pl.BlockSpec((tm, input_dim), lambda i: (i, 0)),   # x: streamed fp32
            pl.BlockSpec((input_dim, hidden), const2d),        # w1 (bf16, resident)
            pl.BlockSpec((1, hidden), const2d),                # b1
            pl.BlockSpec((hidden, hidden), const2d),           # w2
            pl.BlockSpec((1, hidden), const2d),                # b2
            pl.BlockSpec((hidden, num_classes), const2d),      # w3
            pl.BlockSpec((1, num_classes), const2d),           # b3
        ],
        out_specs=pl.BlockSpec((tm, num_classes), lambda i: (i, 0)),
        compiler_params=pltpu.CompilerParams(**cp_kwargs),
    )(x2d, w1, b1, w2, b2, w3, b3)
    return out


def init_params(key, input_dim, hidden_size, num_classes):
    """Deterministic init matching nn.Linear shapes (uniform +-1/sqrt(fan_in))."""
    ks = jax.random.split(key, 6)

    def linear(kw, kb, fan_in, fan_out):
        bound = 1.0 / jnp.sqrt(fan_in)
        w = jax.random.uniform(kw, (fan_in, fan_out), jnp.float32, -bound, bound)
        b = jax.random.uniform(kb, (1, fan_out), jnp.float32, -bound, bound)
        return w, b

    w1, b1 = linear(ks[0], ks[1], input_dim, hidden_size)
    w2, b2 = linear(ks[2], ks[3], hidden_size, hidden_size)
    w3, b3 = linear(ks[4], ks[5], hidden_size, num_classes)
    return (w1, b1, w2, b2, w3, b3)


if __name__ == "__main__":
    key = jax.random.PRNGKey(0)
    k_x, k_p = jax.random.split(key)

    # NCHW input, flattened inside the wrapper: input_dim = 4*16*16 = 1024
    B, C, H, W = 2, 4, 16, 16
    input_dim = C * H * W
    hidden_size = 32
    num_classes = 10

    x = jax.random.normal(k_x, (B, C, H, W), jnp.float32)
    params = init_params(k_p, input_dim, hidden_size, num_classes)
    prepped = preprocess_params(params)   # one-time weight prep (bf16, bias rows)

    out = mlp_forward(x, prepped)
    jax.block_until_ready(out)

    # Pure-JAX reference with the same bf16 weight/activation rounding, fp32 accum.
    w1, b1, w2, b2, w3, b3 = params
    x2d = x.reshape(-1, input_dim)
    xb = x2d.astype(jnp.bfloat16).astype(jnp.float32)
    w1f = w1.astype(jnp.bfloat16).astype(jnp.float32)
    w2f = w2.astype(jnp.bfloat16).astype(jnp.float32)
    w3f = w3.astype(jnp.bfloat16).astype(jnp.float32)
    ref = xb @ w1f + b1
    ref = jnp.maximum(ref, 0.0).astype(jnp.bfloat16).astype(jnp.float32) @ w2f + b2
    ref = jnp.maximum(ref, 0.0).astype(jnp.bfloat16).astype(jnp.float32) @ w3f + b3

    assert out.shape == (B, num_classes)
    assert jnp.allclose(out, ref, atol=1e-2, rtol=1e-2), (
        float(jnp.max(jnp.abs(out - ref))))

    print("KERNEL_OK")
</pallas_src>

<mosaic_0001>
module attributes {stable_mosaic.version = 11 : i64} {
  func.func @mlp_kernel(%arg0: i32, %arg1: memref<8x1024xf32, #tpu.memory_space<vmem>>, %arg2: memref<1024x32xbf16, #tpu.memory_space<vmem>>, %arg3: memref<1x32xf32, #tpu.memory_space<vmem>>, %arg4: memref<32x32xbf16, #tpu.memory_space<vmem>>, %arg5: memref<1x32xf32, #tpu.memory_space<vmem>>, %arg6: memref<32x10xbf16, #tpu.memory_space<vmem>>, %arg7: memref<1x10xf32, #tpu.memory_space<vmem>>, %arg8: memref<8x10xf32, #tpu.memory_space<vmem>>) attributes {dimension_semantics = [#tpu.dimension_semantics<parallel>], iteration_bounds = array<i64: 1>, scalar_prefetch = 0 : i64, scratch_operands = 0 : i64, tpu.core_type = #tpu.core_type<tc>, window_params = [{transform_indices = @transform_0, window_bounds = array<i64: 8, 1024>}, {pipeline_mode = #tpu.pipeline_mode<synchronous>, transform_indices = @transform_1, window_bounds = array<i64: 1024, 32>}, {pipeline_mode = #tpu.pipeline_mode<synchronous>, transform_indices = @transform_2, window_bounds = array<i64: 1, 32>}, {pipeline_mode = #tpu.pipeline_mode<synchronous>, transform_indices = @transform_3, window_bounds = array<i64: 32, 32>}, {pipeline_mode = #tpu.pipeline_mode<synchronous>, transform_indices = @transform_4, window_bounds = array<i64: 1, 32>}, {pipeline_mode = #tpu.pipeline_mode<synchronous>, transform_indices = @transform_5, window_bounds = array<i64: 32, 10>}, {pipeline_mode = #tpu.pipeline_mode<synchronous>, transform_indices = @transform_6, window_bounds = array<i64: 1, 10>}, {transform_indices = @transform_7, window_bounds = array<i64: 8, 10>}]} {
    %c0 = arith.constant 0 : index
    %c0_0 = arith.constant 0 : index
    %0 = vector.load %arg1[%c0, %c0_0] : memref<8x1024xf32, #tpu.memory_space<vmem>>, vector<8x1024xf32>
    %1 = arith.truncf %0 : vector<8x1024xf32> to vector<8x1024xbf16>
    %c0_1 = arith.constant 0 : index
    %c0_2 = arith.constant 0 : index
    %2 = vector.load %arg2[%c0_1, %c0_2] : memref<1024x32xbf16, #tpu.memory_space<vmem>>, vector<1024x32xbf16>
    %cst = arith.constant dense<0.000000e+00> : vector<8x32xf32>
    %3 = tpu.matmul %1, %2, %cst {dimension_numbers = #tpu.dot_dimension_numbers<[1], [0], [0], [1], [0, 0, 1, 1], [], []>} : vector<8x1024xbf16>, vector<1024x32xbf16>, vector<8x32xf32> -> vector<8x32xf32>
    %c0_3 = arith.constant 0 : index
    %c0_4 = arith.constant 0 : index
    %4 = vector.load %arg3[%c0_3, %c0_4] : memref<1x32xf32, #tpu.memory_space<vmem>>, vector<1x32xf32>
    %5 = vector.broadcast %4 : vector<1x32xf32> to vector<8x32xf32>
    %6 = arith.addf %3, %5 : vector<8x32xf32>
    %cst_5 = arith.constant 0.000000e+00 : f32
    %7 = vector.broadcast %cst_5 : f32 to vector<8x32xf32>
    %8 = arith.maximumf %6, %7 : vector<8x32xf32>
    %9 = arith.truncf %8 : vector<8x32xf32> to vector<8x32xbf16>
    %c0_6 = arith.constant 0 : index
    %c0_7 = arith.constant 0 : index
    %10 = vector.load %arg4[%c0_6, %c0_7] : memref<32x32xbf16, #tpu.memory_space<vmem>>, vector<32x32xbf16>
    %cst_8 = arith.constant dense<0.000000e+00> : vector<8x32xf32>
    %11 = tpu.matmul %9, %10, %cst_8 {dimension_numbers = #tpu.dot_dimension_numbers<[1], [0], [0], [1], [0, 0, 1, 1], [], []>} : vector<8x32xbf16>, vector<32x32xbf16>, vector<8x32xf32> -> vector<8x32xf32>
    %c0_9 = arith.constant 0 : index
    %c0_10 = arith.constant 0 : index
    %12 = vector.load %arg5[%c0_9, %c0_10] : memref<1x32xf32, #tpu.memory_space<vmem>>, vector<1x32xf32>
    %13 = vector.broadcast %12 : vector<1x32xf32> to vector<8x32xf32>
    %14 = arith.addf %11, %13 : vector<8x32xf32>
    %cst_11 = arith.constant 0.000000e+00 : f32
    %15 = vector.broadcast %cst_11 : f32 to vector<8x32xf32>
    %16 = arith.maximumf %14, %15 : vector<8x32xf32>
    %17 = arith.truncf %16 : vector<8x32xf32> to vector<8x32xbf16>
    %c0_12 = arith.constant 0 : index
    %c0_13 = arith.constant 0 : index
    %18 = vector.load %arg6[%c0_12, %c0_13] : memref<32x10xbf16, #tpu.memory_space<vmem>>, vector<32x10xbf16>
    %cst_14 = arith.constant dense<0.000000e+00> : vector<8x10xf32>
    %19 = tpu.matmul %17, %18, %cst_14 {dimension_numbers = #tpu.dot_dimension_numbers<[1], [0], [0], [1], [0, 0, 1, 1], [], []>} : vector<8x32xbf16>, vector<32x10xbf16>, vector<8x10xf32> -> vector<8x10xf32>
    %c0_15 = arith.constant 0 : index
    %c0_16 = arith.constant 0 : index
    %20 = vector.load %arg7[%c0_15, %c0_16] : memref<1x10xf32, #tpu.memory_space<vmem>>, vector<1x10xf32>
    %21 = vector.broadcast %20 : vector<1x10xf32> to vector<8x10xf32>
    %22 = arith.addf %19, %21 : vector<8x10xf32>
    %c0_17 = arith.constant 0 : index
    %c0_18 = arith.constant 0 : index
    %23 = vector.load %arg8[%c0_17, %c0_18] : memref<8x10xf32, #tpu.memory_space<vmem>>, vector<8x10xf32>
    tpu.vector_store %arg8[%c0_17, %c0_18], %22 {strides = array<i32>} : memref<8x10xf32, #tpu.memory_space<vmem>>, vector<8x10xf32>,
    return
  }
  func.func @transform_0(%arg0: i32) -> (i32, i32) {
    %c0_i32 = arith.constant 0 : i32
    %c0_i32_0 = arith.constant 0 : i32
    return %arg0, %c0_i32 : i32, i32
  }
  func.func @transform_1(%arg0: i32) -> (i32, i32) {
    %c0_i32 = arith.constant 0 : i32
    %c0_i32_0 = arith.constant 0 : i32
    %c0_i32_1 = arith.constant 0 : i32
    return %c0_i32, %c0_i32_0 : i32, i32
  }
  func.func @transform_2(%arg0: i32) -> (i32, i32) {
    %c0_i32 = arith.constant 0 : i32
    %c0_i32_0 = arith.constant 0 : i32
    %c0_i32_1 = arith.constant 0 : i32
    return %c0_i32, %c0_i32_0 : i32, i32
  }
  func.func @transform_3(%arg0: i32) -> (i32, i32) {
    %c0_i32 = arith.constant 0 : i32
    %c0_i32_0 = arith.constant 0 : i32
    %c0_i32_1 = arith.constant 0 : i32
    return %c0_i32, %c0_i32_0 : i32, i32
  }
  func.func @transform_4(%arg0: i32) -> (i32, i32) {
    %c0_i32 = arith.constant 0 : i32
    %c0_i32_0 = arith.constant 0 : i32
    %c0_i32_1 = arith.constant 0 : i32
    return %c0_i32, %c0_i32_0 : i32, i32
  }
  func.func @transform_5(%arg0: i32) -> (i32, i32) {
    %c0_i32 = arith.constant 0 : i32
    %c0_i32_0 = arith.constant 0 : i32
    %c0_i32_1 = arith.constant 0 : i32
    return %c0_i32, %c0_i32_0 : i32, i32
  }
  func.func @transform_6(%arg0: i32) -> (i32, i32) {
    %c0_i32 = arith.constant 0 : i32
    %c0_i32_0 = arith.constant 0 : i32
    %c0_i32_1 = arith.constant 0 : i32
    return %c0_i32, %c0_i32_0 : i32, i32
  }
  func.func @transform_7(%arg0: i32) -> (i32, i32) {
    %c0_i32 = arith.constant 0 : i32
    %c0_i32_0 = arith.constant 0 : i32
    return %arg0, %c0_i32 : i32, i32
  }
}

</mosaic_0001>

<bundles_post_ra>
// kernel: tpu_custom_call.1
= control target key start
LH: loop header
LB: loop body
LE: loop exit
PB: predicated region body
PF: predicated region fallthrough
CT: control target
= control target key end

     0   :  { %12 = vsyncpa [#allocation3], 0  ;;  %v51_v29 = vlaneseq  ;;  %v1257_v34 = vmov 1983009808   ;;  %vm1259_vm0 = vmmov 0   ;;  %vm836_vm1 = vcmask 261120   ;;  %s1553_s0 = inlined_call_operand.vmem [shape: f32[2,1024], index: 0, kind: input, shape index: {}]   ;;  %s1554_s1 = inlined_call_operand.vmem [shape: bf16[1024,32], index: 1, kind: input, shape index: {}]   ;;  %s1555_s2 = inlined_call_operand.vmem [shape: f32[1,32], index: 2, kind: input, shape index: {}]   ;;  %s1556_s3 = inlined_call_operand.vmem [shape: bf16[32,32], index: 3, kind: input, shape index: {}]   ;;  %s1557_s4 = inlined_call_operand.vmem [shape: f32[1,32], index: 4, kind: input, shape index: {}]   ;;  %s1558_s5 = inlined_call_operand.vmem [shape: bf16[32,10], index: 5, kind: input, shape index: {}]   ;;  %s1559_s6 = inlined_call_operand.vmem [shape: f32[1,10], index: 6, kind: input, shape index: {}]   ;;  %s1560_s7 = inlined_call_operand.hbm [shape: f32[2,10], index: 7, kind: output, shape index: {}]  }
   0x1   :  { %v1155_v0 = vld [vmem:[%s1554_s1 + $0x78] sm:$0xff]   ;;  %v1159_v4 = vld [vmem:[%s1554_s1 + $0x70] sm:$0xff]   ;;  %v1163_v8 = vld [vmem:[%s1554_s1 + $0x68] sm:$0xff]   ;;  %v49_v35 = vunpack.c.l.s4 %v1257_v34  ;;  %vm948_vm2 = vcmask 80896  }
   0x2   :  { %v1156_v1 = vld [vmem:[%s1554_s1 + $0xf8] sm:$0xff]   ;;  %1039 = vmatprep.subr.bf16.mxu0 %v1155_v0  ;;  %v1160_v5 = vld [vmem:[%s1554_s1 + $0xf0] sm:$0xff]   ;;  %v1164_v9 = vld [vmem:[%s1554_s1 + $0xe8] sm:$0xff]   ;;  %v52_v36 = vshrl.u32 %v51_v29, 7 }
   0x3   :  { %v1157_v2 = vld [vmem:[%s1554_s1 + $0x38] sm:$0xff]   ;;  %1061 = vmatprep.subr.bf16.mxu1 %v1156_v1  ;;  %v1161_v6 = vld [vmem:[%s1554_s1 + $0x30] sm:$0xff]   ;;  %v1165_v10 = vld [vmem:[%s1554_s1 + $0x28] sm:$0xff]   ;;  %v50_v40 = vunpack.c.0.s8 %v49_v35 }
   0x4   :  { %v1158_v3 = vld [vmem:[%s1554_s1 + $0xb8] sm:$0xff]   ;;  %1040 = vmatpush3.bf16.msra.mxu0 %v1157_v2  ;;  %v1162_v7 = vld [vmem:[%s1554_s1 + $0xb0] sm:$0xff]   ;;  %v1166_v11 = vld [vmem:[%s1554_s1 + $0xa8] sm:$0xff]  }
   0x5   :  { %1062 = vmatpush3.bf16.msra.mxu1 %v1158_v3  ;;  %1041 = vmatprep.subr.bf16.mxu0 %v1159_v4  ;;  %v1167_v12 = vld [vmem:[%s1554_s1 + $0x60] sm:$0xff]   ;;  %v1171_v16 = vld [vmem:[%s1554_s1 + $0x58] sm:$0xff]   ;;  %v1175_v20 = vld [vmem:[%s1554_s1 + $0x50] sm:$0xff]   ;;  %v1417_v43 = vsub.s32 %v50_v40, %v52_v36 }
   0x6   :  { %1063 = vmatprep.subr.bf16.mxu1 %v1160_v5  ;;  %v1168_v13 = vld [vmem:[%s1554_s1 + $0xe0] sm:$0xff]   ;;  %v1172_v17 = vld [vmem:[%s1554_s1 + $0xd8] sm:$0xff]   ;;  %v1176_v21 = vld [vmem:[%s1554_s1 + $0xd0] sm:$0xff]  }
   0x7   :  { %v1169_v14 = vld [vmem:[%s1554_s1 + $0x20] sm:$0xff]   ;;  %v1173_v18 = vld [vmem:[%s1554_s1 + $0x18] sm:$0xff]   ;;  %v1177_v22 = vld [vmem:[%s1554_s1 + $0x10] sm:$0xff]  }
   0x8   :  { %1042 = vmatpush3.bf16.msra.mxu0 %v1161_v6  ;;  %v1170_v15 = vld [vmem:[%s1554_s1 + $0xa0] sm:$0xff]   ;;  %v1174_v19 = vld [vmem:[%s1554_s1 + $0x98] sm:$0xff]   ;;  %v1178_v23 = vld [vmem:[%s1554_s1 + $0x90] sm:$0xff]  }
   0x9   :  { %1064 = vmatpush3.bf16.msra.mxu1 %v1162_v7  ;;  %1043 = vmatprep.subr.bf16.mxu0 %v1163_v8  ;;  %v1179_v24 = vld [vmem:[%s1554_s1 + $0x48] sm:$0xff]   ;;  %v1183_v28 = vld [vmem:[%s1554_s1 + $0x40] sm:$0xff]   ;;  %v1193_v41 = vld [vmem:[%s1554_s1 + $0x178] sm:$0xff]  }
   0xa   :  { %1065 = vmatprep.subr.bf16.mxu1 %v1164_v9  ;;  %v1180_v25 = vld [vmem:[%s1554_s1 + $0xc8] sm:$0xff]   ;;  %v1184_v30 = vld [vmem:[%s1554_s1 + $0xc0] sm:$0xff]   ;;  %v1194_v42 = vld [vmem:[%s1554_s1 + $0x1f8] sm:$0xff]  }
   0xb   :  { %v1181_v26 = vld [vmem:[%s1554_s1 + $0x8] sm:$0xff]   ;;  %v1185_v31 = vld [vmem:[%s1554_s1] sm:$0xff]   ;;  %v1195_v52 = vld [vmem:[%s1554_s1 + $0x138] sm:$0xff]  }
   0xc   :  { %1044 = vmatpush3.bf16.msra.mxu0 %v1165_v10  ;;  %v1182_v27 = vld [vmem:[%s1554_s1 + $0x88] sm:$0xff]   ;;  %v1186_v32 = vld [vmem:[%s1554_s1 + $0x80] sm:$0xff]   ;;  %v1196_v53 = vld [vmem:[%s1554_s1 + $0x1b8] sm:$0xff]  }
   0xd   :  { %1066 = vmatpush3.bf16.msra.mxu1 %v1166_v11  ;;  %1045 = vmatprep.subr.bf16.mxu0 %v1167_v12  ;;  %v1187_v33 = vld [vmem:[%s1553_s0] ss:$16 sps:$4 sm:$0xff]   ;;  %v1191_v38 = vld [vmem:[%s1553_s0 + $0x4] ss:$16 sps:$4 sm:$0xff]   ;;  %v1201_v62 = vld [vmem:[%s1554_s1 + $0x168] sm:$0xff]  }
   0xe   :  { %1067 = vmatprep.subr.bf16.mxu1 %v1168_v13  ;;  %v1189_v37 = vld [vmem:[%s1553_s0 + $0x20] ss:$16 sps:$4 sm:$0xff]   ;;  %v1192_v39 = vld [vmem:[%s1553_s0 + $0x24] ss:$16 sps:$4 sm:$0xff]   ;;  %v54_v44 = vrot.slane %v1187_v33, %v1417_v43  ;;  %v61_v46 = vrot.slane %v1191_v38, %v1417_v43  ;;  %v1202_v63 = vld [vmem:[%s1554_s1 + $0x1e8] sm:$0xff]  }
   0xf   :  { %v68_v45 = vrot.slane %v1189_v37, %v1417_v43  ;;  %v75_v47 = vrot.slane %v1192_v39, %v1417_v43  ;;  %v1197_v58 = vld [vmem:[%s1554_s1 + $0x170] sm:$0xff]   ;;  %v1203_v0 = vld [vmem:[%s1554_s1 + $0x128] sm:$0xff]   ;;  %v1205_v2 = vld [vmem:[%s1554_s1 + $0x160] sm:$0xff]   ;;  %v1258_v39 = vmov 0.0  }
  0x10   :  { %1046 = vmatpush3.bf16.msra.mxu0 %v1169_v14  ;;  %v1198_v59 = vld [vmem:[%s1554_s1 + $0x1f0] sm:$0xff]   ;;  %v1204_v1 = vld [vmem:[%s1554_s1 + $0x1a8] sm:$0xff]   ;;  %v1206_v3 = vld [vmem:[%s1554_s1 + $0x1e0] sm:$0xff]  }
  0x11   :  { %1068 = vmatpush3.bf16.msra.mxu1 %v1170_v15  ;;  %1047 = vmatprep.subr.bf16.mxu0 %v1171_v16  ;;  %v77_v48 = vcombine.high %v54_v44, %v68_v45  ;;  %v79_v49 = vcombine.high %v61_v46, %v75_v47  ;;  %v76_v50 = vcombine.low %v54_v44, %v68_v45  ;;  %v1199_v60 = vld [vmem:[%s1554_s1 + $0x130] sm:$0xff]   ;;  %v1207_v4 = vld [vmem:[%s1554_s1 + $0x120] sm:$0xff]   ;;  %v1209_v6 = vld [vmem:[%s1554_s1 + $0x158] sm:$0xff]  }
  0x12   :  { %1069 = vmatprep.subr.bf16.mxu1 %v1172_v17  ;;  %v78_v51 = vcombine.low %v61_v46, %v75_v47  ;;  %v1200_v61 = vld [vmem:[%s1554_s1 + $0x1b0] sm:$0xff]   ;;  %v1208_v5 = vld [vmem:[%s1554_s1 + $0x1a0] sm:$0xff]   ;;  %v1210_v7 = vld [vmem:[%s1554_s1 + $0x1d8] sm:$0xff]  }
  0x13   :  { %v125_v54 = vpack.c.bf16 %v77_v48, %v77_v48  ;;  %v127_v55 = vpack.c.bf16 %v79_v49, %v79_v49  ;;  %v124_v56 = vpack.c.bf16 %v76_v50, %v76_v50  ;;  %v1211_v8 = vld [vmem:[%s1554_s1 + $0x118] sm:$0xff]   ;;  %v1213_v10 = vld [vmem:[%s1554_s1 + $0x150] sm:$0xff]   ;;  %v1217_v14 = vld [vmem:[%s1554_s1 + $0x148] sm:$0xff]  }
  0x14   :  { %1048 = vmatpush3.bf16.msra.mxu0 %v1173_v18  ;;  %v126_v57 = vpack.c.bf16 %v78_v51, %v78_v51  ;;  %v1212_v9 = vld [vmem:[%s1554_s1 + $0x198] sm:$0xff]   ;;  %v1214_v11 = vld [vmem:[%s1554_s1 + $0x1d0] sm:$0xff]   ;;  %v1218_v15 = vld [vmem:[%s1554_s1 + $0x1c8] sm:$0xff]  }
  0x15   :  { %1070 = vmatpush3.bf16.msra.mxu1 %v1174_v19  ;;  %1049 = vmatprep.subr.bf16.mxu0 %v1175_v20  ;;  %v1215_v12 = vld [vmem:[%s1554_s1 + $0x110] sm:$0xff]   ;;  %v1219_v16 = vld [vmem:[%s1554_s1 + $0x108] sm:$0xff]   ;;  %v1221_v18 = vld [vmem:[%s1554_s1 + $0x140] sm:$0xff]  }
  0x16   :  { %1071 = vmatprep.subr.bf16.mxu1 %v1176_v21  ;;  %683 = vmatprep.mubr.bf16.mxu0 %v125_v54  ;;  %v1216_v13 = vld [vmem:[%s1554_s1 + $0x190] sm:$0xff]   ;;  %v1220_v17 = vld [vmem:[%s1554_s1 + $0x188] sm:$0xff]   ;;  %v1222_v19 = vld [vmem:[%s1554_s1 + $0x1c0] sm:$0xff]  }
  0x17   :  { %723 = vmatprep.mubr.bf16.mxu1 %v127_v55  ;;  %v1225_v20 = vld [vmem:[%s1553_s0 + $0x8] ss:$16 sps:$4 sm:$0xff]   ;;  %v1232_v40 = vld [vmem:[%s1556_s3] sm:$0xff]  }
  0x18   :  { %1050 = vmatpush3.bf16.msra.mxu0 %v1177_v22  ;;  %v1227_v21 = vld [vmem:[%s1553_s0 + $0x28] ss:$16 sps:$4 sm:$0xff]   ;;  %v1223_v22 = vld [vmem:[%s1554_s1 + $0x100] sm:$0xff]  }
  0x19   :  { %1072 = vmatpush3.bf16.msra.mxu1 %v1178_v23  ;;  %1051 = vmatprep.subr.bf16.mxu0 %v1179_v24  ;;  %v1224_v23 = vld [vmem:[%s1554_s1 + $0x180] sm:$0xff]   ;;  %v1229_v24 = vld [vmem:[%s1553_s0 + $0xc] ss:$16 sps:$4 sm:$0xff]  }
  0x1a   :  { %1073 = vmatprep.subr.bf16.mxu1 %v1180_v25  ;;  %v1230_v25 = vld [vmem:[%s1553_s0 + $0x2c] ss:$16 sps:$4 sm:$0xff]   ;;  %v966_v51 = vld [vmem:[%s1555_s2] ss:$0 sm:$0xff] }
  0x1b   :  { %v111_v29 = vrot.slane %v1230_v25, %v1417_v43  ;;  %v1231_v38 = vld [vmem:[%s1556_s3 + $0x8] sm:$0xff]  }
  0x1c   :  { %1052 = vmatpush3.bf16.msra.mxu0 %v1181_v26  ;;  %v90_v26 = vrot.slane %v1225_v20, %v1417_v43 }
  0x1d   :  { %1074 = vmatpush3.bf16.msra.mxu1 %v1182_v27  ;;  %1053 = vmatprep.subr.bf16.mxu0 %v1183_v28  ;;  %v104_v27 = vrot.slane %v1227_v21, %v1417_v43  ;;  %v97_v28 = vrot.slane %v1229_v24, %v1417_v43 }
  0x1e   :  { %1075 = vmatprep.subr.bf16.mxu1 %v1184_v30 }
  0x1f   :  { %v113_v30 = vcombine.high %v90_v26, %v104_v27  ;;  %v114_v33 = vcombine.low %v97_v28, %v111_v29 }
  0x20   :  { %1054 = vmatpush3.bf16.msra.mxu0 %v1185_v31  ;;  %v112_v31 = vcombine.low %v90_v26, %v104_v27 }
  0x21   :  { %1076 = vmatpush3.bf16.msra.mxu1 %v1186_v32  ;;  %1083 = vmatprep.subr.bf16.mxu0 %v1193_v41  ;;  %v115_v32 = vcombine.high %v97_v28, %v111_v29  ;;  %v129_v34 = vpack.c.bf16 %v113_v30, %v113_v30  ;;  %v130_v37 = vpack.c.bf16 %v114_v33, %v114_v33  ;;  %v1233_v41 = vld [vmem:[%s1558_s5 + $0x8] sm:$0xff]  }
  0x22   :  { %1105 = vmatprep.subr.bf16.mxu1 %v1194_v42  ;;  %v128_v35 = vpack.c.bf16 %v112_v31, %v112_v31 }
  0x23   :  { %684 = vmatmul.mubr.bf16.vlgmr.msra.gmra.mxu0 %v124_v56  ;;  %v131_v36 = vpack.c.bf16 %v115_v32, %v115_v32 }
  0x24   :  { %724 = vmatmul.mubr.bf16.vlgmr.msra.gmra.mxu1 %v126_v57  ;;  %1084 = vmatpush3.bf16.msra.mxu0 %v1195_v52 }
  0x25   :  { %1106 = vmatpush3.bf16.msra.mxu1 %v1196_v53  ;;  %1085 = vmatprep.subr.bf16.mxu0 %v1197_v58 }
  0x26   :  { %1107 = vmatprep.subr.bf16.mxu1 %v1198_v59  ;;  %763 = vmatprep.mubr.bf16.mxu0 %v129_v34 }
  0x27   :  { %803 = vmatprep.mubr.bf16.mxu1 %v131_v36 }
  0x28   :  { %1086 = vmatpush3.bf16.msra.mxu0 %v1199_v60 }
  0x29   :  { %1108 = vmatpush3.bf16.msra.mxu1 %v1200_v61  ;;  %1087 = vmatprep.subr.bf16.mxu0 %v1201_v62 }
  0x2a   :  { %1109 = vmatprep.subr.bf16.mxu1 %v1202_v63 }
  0x2c   :  { %1088 = vmatpush3.bf16.msra.mxu0 %v1203_v0 }
  0x2d   :  { %1110 = vmatpush3.bf16.msra.mxu1 %v1204_v1  ;;  %1089 = vmatprep.subr.bf16.mxu0 %v1205_v2 }
  0x2e   :  { %1111 = vmatprep.subr.bf16.mxu1 %v1206_v3 }
  0x30   :  { %1090 = vmatpush3.bf16.msra.mxu0 %v1207_v4 }
  0x31   :  { %1112 = vmatpush3.bf16.msra.mxu1 %v1208_v5  ;;  %1091 = vmatprep.subr.bf16.mxu0 %v1209_v6  ;;  %v1234_v5 = vld [vmem:[%s1558_s5] sm:$0xff]  }
  0x32   :  { %1113 = vmatprep.subr.bf16.mxu1 %v1210_v7  ;;  %v1031_v6 = vld [vmem:[%s1557_s4] ss:$0 sm:$0xff] }
  0x34   :  { %1092 = vmatpush3.bf16.msra.mxu0 %v1211_v8 }
  0x35   :  { %1114 = vmatpush3.bf16.msra.mxu1 %v1212_v9  ;;  %1093 = vmatprep.subr.bf16.mxu0 %v1213_v10 }
  0x36   :  { %1115 = vmatprep.subr.bf16.mxu1 %v1214_v11 }
  0x38   :  { %1094 = vmatpush3.bf16.msra.mxu0 %v1215_v12 }
  0x39   :  { %1116 = vmatpush3.bf16.msra.mxu1 %v1216_v13  ;;  %1095 = vmatprep.subr.bf16.mxu0 %v1217_v14  ;;  %v1035_v14 = vld [vmem:[%s1559_s6] ss:$0 sm:$0xff] }
  0x3a   :  { %1117 = vmatprep.subr.bf16.mxu1 %v1218_v15 }
  0x3c   :  { %1096 = vmatpush3.bf16.msra.mxu0 %v1219_v16 }
  0x3d   :  { %1118 = vmatpush3.bf16.msra.mxu1 %v1220_v17  ;;  %1097 = vmatprep.subr.bf16.mxu0 %v1221_v18 }
  0x3e   :  { %1119 = vmatprep.subr.bf16.mxu1 %v1222_v19 }
  0x40   :  { %1098 = vmatpush3.bf16.msra.mxu0 %v1223_v22 }
  0x41   :  { %1120 = vmatpush3.bf16.msra.mxu1 %v1224_v23  ;;  %1133 = vmatprep.subr.bf16.mxu0 %v1258_v39 }
  0x42   :  { %1141 = vmatprep.subr.bf16.mxu1 %v1258_v39 }
  0x43   :  { %764 = vmatmul.mubr.bf16.vlgmr.msra.gmra.mxu0 %v128_v35 }
  0x44   :  { %804 = vmatmul.mubr.bf16.vlgmr.msra.gmra.mxu1 %v130_v37  ;;  %1134 = vmatpush3.bf16.msra.mxu0 %v1231_v38 }
  0x45   :  { %1135 = vmatprep.subr.bf16.mxu0 %v1258_v39  ;;  %1137 = vmatprep.mubr.msk.bf16.mxu0 %vm1259_vm0, %v1258_v39 }
  0x46   :  { %1145 = vmatprep.mubr.msk.bf16.mxu1 %vm1259_vm0, %v1258_v39  ;;  %1142 = vmatpush3.bf16.msra.mxu1 %v1233_v41 }
  0x47   :  { %1143 = vmatprep.subr.bf16.mxu1 %v1258_v39 }
  0x48   :  { %1136 = vmatpush3.bf16.msra.mxu0 %v1232_v40 }
  0x4a   :  { %1144 = vmatpush3.bf16.msra.mxu1 %v1234_v5 }
  0xe3   :  { %v1055_v42 = vpop.f32.mrf.mxu0 }
  0xe4   :  { %v1077_v43 = vpop.f32.mrf.mxu1 }
  0xe5   :  { %v1056_v44 = vpop.f32.mrf.mxu0 }
  0xe6   :  { %v1078_v45 = vpop.f32.mrf.mxu1  ;;  %v1057_v50 = vadd.f32 %v1056_v44, %v1055_v42 }
  0xe7   :  { %v1058_v46 = vpop.f32.mrf.mxu0  ;;  %v1079_v53 = vadd.f32 %v1078_v45, %v1077_v43 }
  0xe8   :  { %v1080_v47 = vpop.f32.mrf.mxu1  ;;  %v686_v52 = vadd.f32 %v1057_v50, %v966_v51 }
  0xe9   :  { %v1059_v48 = vpop.f32.mrf.mxu0 }
  0xea   :  { %v1081_v49 = vpop.f32.mrf.mxu1  ;;  %v726_v58 = vadd.f32 %v1079_v53, %v686_v52 }
 0x103   :  { %v1099_v54 = vpop.f32.mrf.mxu0 }
 0x104   :  { %v1121_v55 = vpop.f32.mrf.mxu1 }
 0x105   :  { %v1100_v56 = vpop.f32.mrf.mxu0 }
 0x106   :  { %v1122_v57 = vpop.f32.mrf.mxu1  ;;  %v1101_v59 = vadd.f32 %v1100_v56, %v1099_v54 }
 0x107   :  { %v1102_v60 = vpop.f32.mrf.mxu0  ;;  %v1123_v63 = vadd.f32 %v1122_v57, %v1121_v55 }
 0x108   :  { %v1124_v61 = vpop.f32.mrf.mxu1  ;;  %v766_v62 = vadd.f32 %v1101_v59, %v726_v58 }
 0x109   :  { %v1103_v0 = vpop.f32.mrf.mxu0 }
 0x10a   :  { %v1125_v1 = vpop.f32.mrf.mxu1  ;;  %v806_v2 = vadd.f32 %v1123_v63, %v766_v62 }
 0x10c   :  { %v811_v3 = vmax.f32 %v806_v2, 0.0 }
 0x10e   :  { %v812_v4 = vpack.c.bf16 %v811_v3, %v811_v3 }
 0x110   :  { %1138 = vmatmul.mubr.msk.bf16.vlgmr.msra.gmra.mxu0 %vm836_vm1, %v812_v4 }
 0x1d0   :  { %v874_v7 = vpop.f32.mrf.mxu0 }
 0x1d1   :  { %v875_v8 = vadd.f32 %v1031_v6, %v874_v7 }
 0x1d2   :  { %v1139_v9 = vpop.f32.mrf.mxu0 }
 0x1d3   :  { %v880_v10 = vmax.f32 %v875_v8, 0.0 }
 0x1d4   :  { %v877_v11 = vpop.f32.mrf.mxu0 }
 0x1d5   :  { %v881_v12 = vpack.c.bf16 %v880_v10, %v880_v10 }
 0x1d6   :  { %v1140_v13 = vpop.f32.mrf.mxu0 }
 0x1d7   :  { %1146 = vmatmul.mubr.msk.bf16.vlgmr.msra.gmra.mxu1 %vm836_vm1, %v881_v12 }
 0x297   :  { %v942_v15 = vpop.f32.mrf.mxu1 }
 0x298   :  { %v943_v16 = vadd.f32 %v1035_v14, %v942_v15 }
 0x299   :  { %v1147_v17 = vpop.f32.mrf.mxu1 }
 0x29a   :  { %949 = vst.msk [vmem:[#allocation2] sm:$0xff] %vm948_vm2, %v943_v16 }
 0x29b   :  { %v945_v18 = vpop.f32.mrf.mxu1 }
 0x29d   :  { %v1148_v19 = vpop.f32.mrf.mxu1 }
 0x29e   :  { %954 = vsyncadd [#allocation3], 96  ;;  %s1260_s4 = smov [#allocation2]  }
 0x29f   :  { %s955_s5 = sshll.u32 %s1260_s4, 4  ;;  %s956_s5 = int_to_ptr.vmem [resolvable:$true] %s955_s5 }
 0x2a0   :  { %s1235_s17 = scalar_lea.vmem %s956_s5, 32  ;;  %s1239_s18 = scalar_lea.vmem %s956_s5, 128 }
 0x2a1   :  { %p1236_p0 = scmp.ne.s32.totalorder %s956_s5, %s1235_s17  ;;  %p1240_p1 = scmp.lt.s32.totalorder %s956_s5, %s956_s5 }
 0x2a2   :  { %p1241_p2 = scmp.lt.s32.totalorder %s1239_s18, %s1235_s17 }
 0x2a4   :  { %p1242_p3 = por %p1241_p2, %p1240_p1 }
 0x2a6   :  { %p1243_p4 = pnand %p1242_p3, %p1236_p0 }
 0x2a8   :  { %1246 = shalt.err (!%p1243_p4)
}
 0x2a9   :  { %s1261_s6 = smov 32   ;;  %s1262_s19 = smov 2  }
 0x2aa   :  { %961 = dma.vmem_to_hbm [thread:$0]  %s956_s5, 32, %s1560_s7, [#allocation3], %s1261_s6, %s1261_s6, %s1262_s19  }
 0x2ab   :  { %1255 = dma.done.wait [#allocation3], 128  }
 0x2ac   :  { %1256 = vsyncadd [#allocation3], 4294967168 }
 0x2ad   :  { %965 = vsyncpa [#allocation3], 1 }

</bundles_post_ra>
